<compile_context>
chip_gen: v7x
topology: tpu7x:2x2x1
jax: 0.10.0
libtpu: 0.0.40
codegen_flags: <defaults>
</compile_context>

<pallas_src>
import math
import jax
import jax.numpy as jnp
from jax.experimental import pallas as pl
from jax.experimental.pallas import tpu as pltpu

# ---- model config (small, deterministic) ----
B = 2          # batch
T = 8          # sequence length
C = 32         # n_embd
N_HEAD = 4
HD = C // N_HEAD
BT = B * T
EPS = 1e-5
LANE = 128     # lane-tile width used for packing alignment

# packed weight-slab column offsets (each segment starts on a lane tile)
W_QKV_OFF = 0 * LANE      # (C, 3C) qkv weight (head-major cols, Q pre-scaled)
W_APROJ_OFF = 1 * LANE    # (C, C)  attention output projection
W_FC_OFF = 2 * LANE       # (C, 4C) MLP fc weight
W_IN_COLS = 3 * LANE

# packed vector-slab rows (each row is one 128-lane f32 row)
ROW_B_QKV = 0     # [:3C]  qkv bias (head-major, Q part pre-scaled)
ROW_B_FC = 1      # [:4C]  fc bias
ROW_LN1_W = 2     # [:C]
ROW_LN1_B = 3     # [:C]
ROW_LN2_W = 4     # [:C]
ROW_LN2_B = 5     # [:C]
ROW_B_APROJ = 6   # [:C]
ROW_B_MPROJ = 7   # [:C]
VEC_ROWS = 8


def block_kernel(x_ref, w_in_ref, w_mproj_ref, vec_ref, o_ref):
    # Single grid point: everything lives in VMEM, all compute in f32.
    xf = x_ref[...].astype(jnp.float32)                # (BT, C)

    w_in = w_in_ref[...]                               # (C, 3*128)
    w_qkv = w_in[:, W_QKV_OFF:W_QKV_OFF + 3 * C]       # (C, 3C) head-major
    w_aproj = w_in[:, W_APROJ_OFF:W_APROJ_OFF + C]     # (C, C)
    w_fc = w_in[:, W_FC_OFF:W_FC_OFF + 4 * C]          # (C, 4C)

    vp = vec_ref[...]                                  # (8, 128)
    b_qkv = vp[ROW_B_QKV:ROW_B_QKV + 1, :3 * C]        # (1, 3C) head-major
    b_fc = vp[ROW_B_FC:ROW_B_FC + 1, :4 * C]           # (1, 4C)
    ln1_w = vp[ROW_LN1_W:ROW_LN1_W + 1, :C]            # (1, C)
    ln1_b = vp[ROW_LN1_B:ROW_LN1_B + 1, :C]
    ln2_w = vp[ROW_LN2_W:ROW_LN2_W + 1, :C]
    ln2_b = vp[ROW_LN2_B:ROW_LN2_B + 1, :C]
    b_aproj = vp[ROW_B_APROJ:ROW_B_APROJ + 1, :C]
    b_mproj = vp[ROW_B_MPROJ:ROW_B_MPROJ + 1, :C]

    # ---------- LayerNorm 1 ----------
    mu = jnp.mean(xf, axis=-1, keepdims=True)
    var = jnp.mean((xf - mu) ** 2, axis=-1, keepdims=True)
    h = (xf - mu) * jax.lax.rsqrt(var + EPS)
    h = h * ln1_w + ln1_b                              # (BT, C)

    # ---------- Attention ----------
    # Q columns of w_qkv / b_qkv already carry the 1/sqrt(HD) scale, and the
    # columns are head-major: [q_h0 | k_h0 | v_h0 | q_h1 | k_h1 | v_h1 | ...].
    qkv = jnp.dot(h, w_qkv, preferred_element_type=jnp.float32) + b_qkv  # (BT, 3C)
    qkv3 = qkv.reshape(B, T, 3 * C)

    # Per-head attention with the output projection folded into the loop:
    # attn_out += (softmax(q_h k_h^T) v_h) @ w_aproj[rows of head h]
    attn_out = jnp.zeros((BT, C), jnp.float32)
    for hd in range(N_HEAD):                           # static loop over heads
        base = hd * 3 * HD                             # contiguous 24-lane window
        qh = qkv3[:, :, base:base + HD]                # (B, T, HD), pre-scaled
        kh = qkv3[:, :, base + HD:base + 2 * HD]
        vh = qkv3[:, :, base + 2 * HD:base + 3 * HD]
        s = jnp.einsum('btd,bsd->bts', qh, kh,
                       preferred_element_type=jnp.float32)   # (B, T, T)
        s = s - jnp.max(s, axis=-1, keepdims=True)
        p = jnp.exp(s)
        p = p / jnp.sum(p, axis=-1, keepdims=True)     # exact divide
        yh = jnp.einsum('bts,bsd->btd', p, vh,
                        preferred_element_type=jnp.float32)  # (B, T, HD)
        attn_out = attn_out + jnp.dot(
            yh.reshape(BT, HD), w_aproj[hd * HD:(hd + 1) * HD, :],
            preferred_element_type=jnp.float32)        # (BT, C)
    attn_out = attn_out + b_aproj

    # residual 1 (dropout_1 == identity)
    x1 = xf + attn_out                                 # (BT, C)

    # ---------- LayerNorm 2 ----------
    mu2 = jnp.mean(x1, axis=-1, keepdims=True)
    var2 = jnp.mean((x1 - mu2) ** 2, axis=-1, keepdims=True)
    h2 = (x1 - mu2) * jax.lax.rsqrt(var2 + EPS)
    h2 = h2 * ln2_w + ln2_b

    # ---------- MLP ----------
    f = jnp.dot(h2, w_fc, preferred_element_type=jnp.float32) + b_fc   # (BT, 4C)
    f = 0.5 * f * (1.0 + jax.lax.erf(f * (1.0 / math.sqrt(2.0))))      # exact GELU
    mlp_out = jnp.dot(f, w_mproj_ref[...],
                      preferred_element_type=jnp.float32) + b_mproj    # (BT, C)

    # residual 2 (dropout_2 == identity)
    o_ref[...] = (x1 + mlp_out).astype(o_ref.dtype)


@jax.jit
def transformer_block(x, w_in, w_mproj, vec):
    """x: (B, T, C) f32.  w_in: (C, 3*128) packed [w_qkv(head-major) | w_aproj
    | w_fc] (lane-tile aligned).  w_mproj: (4C, C).  vec: (8, 128) packed
    biases/LN params."""
    x2d = x.reshape(BT, C)
    out2d = pl.pallas_call(
        block_kernel,
        out_shape=jax.ShapeDtypeStruct((BT, C), x.dtype),
        grid_spec=pltpu.PrefetchScalarGridSpec(
            num_scalar_prefetch=0,
            grid=(1,),                                  # single grid point
            in_specs=[
                pl.BlockSpec((BT, C), lambda i: (0, 0)),
                pl.BlockSpec((C, W_IN_COLS), lambda i: (0, 0)),
                pl.BlockSpec((4 * C, C), lambda i: (0, 0)),
                pl.BlockSpec((VEC_ROWS, LANE), lambda i: (0, 0)),
            ],
            out_specs=pl.BlockSpec((BT, C), lambda i: (0, 0)),
        ),
        input_output_aliases={0: 0},                    # reuse x's HBM buffer
        compiler_params=pltpu.CompilerParams(
            dimension_semantics=("arbitrary",)),
    )(x2d, w_in, w_mproj, vec)
    return out2d.reshape(B, T, C)


def init_params(key):
    ks = jax.random.split(key, 8)
    scale = 0.02
    return {
        # LayerNorms: PyTorch default init (weight=1, bias=0)
        "ln1_w": jnp.ones((1, C), jnp.float32),
        "ln1_b": jnp.zeros((1, C), jnp.float32),
        "ln2_w": jnp.ones((1, C), jnp.float32),
        "ln2_b": jnp.zeros((1, C), jnp.float32),
        # Linear weights stored transposed: y = x @ W + b
        "w_qkv": scale * jax.random.normal(ks[0], (C, 3 * C), jnp.float32),
        "b_qkv": scale * jax.random.normal(ks[1], (1, 3 * C), jnp.float32),
        "w_aproj": scale * jax.random.normal(ks[2], (C, C), jnp.float32),
        "b_aproj": scale * jax.random.normal(ks[3], (1, C), jnp.float32),
        "w_fc": scale * jax.random.normal(ks[4], (C, 4 * C), jnp.float32),
        "b_fc": scale * jax.random.normal(ks[5], (1, 4 * C), jnp.float32),
        "w_mproj": scale * jax.random.normal(ks[6], (4 * C, C), jnp.float32),
        "b_mproj": scale * jax.random.normal(ks[7], (1, C), jnp.float32),
    }


def pack_params(p):
    """Pack 13 parameter arrays into 3: a lane-aligned weight slab, the MLP
    projection matrix, and an (8,128) vector slab.  The attention scale
    1/sqrt(HD) is folded into Q, and the qkv columns are reordered head-major
    ([q_h0|k_h0|v_h0 | q_h1|...]) so the kernel slices one contiguous window
    per head."""
    sc = 1.0 / math.sqrt(HD)
    w_qkv = p["w_qkv"].at[:, :C].multiply(sc)               # (C, 3C), Q scaled
    b_qkv = p["b_qkv"].reshape(-1).at[:C].multiply(sc)      # (3C,)

    # head-major column permutation
    perm = []
    for hd in range(N_HEAD):
        perm += list(range(0 * C + hd * HD, 0 * C + (hd + 1) * HD))   # Q_h
        perm += list(range(1 * C + hd * HD, 1 * C + (hd + 1) * HD))   # K_h
        perm += list(range(2 * C + hd * HD, 2 * C + (hd + 1) * HD))   # V_h
    perm = jnp.array(perm, jnp.int32)
    w_qkv = w_qkv[:, perm]
    b_qkv = b_qkv[perm]

    w_in = jnp.zeros((C, W_IN_COLS), jnp.float32)
    w_in = w_in.at[:, W_QKV_OFF:W_QKV_OFF + 3 * C].set(w_qkv)
    w_in = w_in.at[:, W_APROJ_OFF:W_APROJ_OFF + C].set(p["w_aproj"])
    w_in = w_in.at[:, W_FC_OFF:W_FC_OFF + 4 * C].set(p["w_fc"])

    vec = jnp.zeros((VEC_ROWS, LANE), jnp.float32)
    vec = vec.at[ROW_B_QKV, :3 * C].set(b_qkv)
    vec = vec.at[ROW_B_FC, :4 * C].set(p["b_fc"].reshape(-1))
    vec = vec.at[ROW_LN1_W, :C].set(p["ln1_w"].reshape(-1))
    vec = vec.at[ROW_LN1_B, :C].set(p["ln1_b"].reshape(-1))
    vec = vec.at[ROW_LN2_W, :C].set(p["ln2_w"].reshape(-1))
    vec = vec.at[ROW_LN2_B, :C].set(p["ln2_b"].reshape(-1))
    vec = vec.at[ROW_B_APROJ, :C].set(p["b_aproj"].reshape(-1))
    vec = vec.at[ROW_B_MPROJ, :C].set(p["b_mproj"].reshape(-1))
    return w_in, p["w_mproj"], vec


def block_reference(x, p):
    """Pure-JAX reference mirroring the PyTorch Block forward (eval mode)."""
    def ln(z, w, b):
        mu = z.mean(-1, keepdims=True)
        var = ((z - mu) ** 2).mean(-1, keepdims=True)
        return (z - mu) / jnp.sqrt(var + EPS) * w + b

    h = ln(x, p["ln1_w"][0], p["ln1_b"][0])
    qkv = h @ p["w_qkv"] + p["b_qkv"][0]
    q, k, v = qkv[..., :C], qkv[..., C:2 * C], qkv[..., 2 * C:]
    q = q.reshape(B, T, N_HEAD, HD).transpose(0, 2, 1, 3)
    k = k.reshape(B, T, N_HEAD, HD).transpose(0, 2, 1, 3)
    v = v.reshape(B, T, N_HEAD, HD).transpose(0, 2, 1, 3)
    s = (q @ jnp.swapaxes(k, -1, -2)) / math.sqrt(HD)
    a = jax.nn.softmax(s, axis=-1)
    y = (a @ v).transpose(0, 2, 1, 3).reshape(B, T, C)
    x = x + y @ p["w_aproj"] + p["b_aproj"][0]
    h2 = ln(x, p["ln2_w"][0], p["ln2_b"][0])
    f = h2 @ p["w_fc"] + p["b_fc"][0]
    f = 0.5 * f * (1.0 + jax.lax.erf(f / math.sqrt(2.0)))
    return x + f @ p["w_mproj"] + p["b_mproj"][0]


if __name__ == "__main__":
    key = jax.random.PRNGKey(0)
    kx, kp = jax.random.split(key)
    x = jax.random.normal(kx, (B, T, C), jnp.float32)
    params = init_params(kp)
    w_in, w_mproj, vec = pack_params(params)

    out = transformer_block(x, w_in, w_mproj, vec)
    jax.block_until_ready(out)
    assert out.shape == (B, T, C)

    # sanity check against a pure-JAX reference (exact softmax divide now;
    # remaining error is f32 reduction-order noise)
    ref = block_reference(x, params)
    max_err = float(jnp.max(jnp.abs(out - ref)))
    assert max_err < 1e-4, f"mismatch vs reference: {max_err}"

    print("KERNEL_OK")
</pallas_src>

<mosaic_0001>
module attributes {stable_mosaic.version = 11 : i64} {
  func.func @block_kernel(%arg0: i32, %arg1: memref<16x32xf32, #tpu.memory_space<vmem>>, %arg2: memref<32x384xf32, #tpu.memory_space<vmem>>, %arg3: memref<128x32xf32, #tpu.memory_space<vmem>>, %arg4: memref<8x128xf32, #tpu.memory_space<vmem>>, %arg5: memref<16x32xf32, #tpu.memory_space<vmem>>) attributes {dimension_semantics = [#tpu.dimension_semantics<arbitrary>], iteration_bounds = array<i64: 1>, scalar_prefetch = 0 : i64, scratch_operands = 0 : i64, tpu.core_type = #tpu.core_type<tc>, window_params = [{pipeline_mode = #tpu.pipeline_mode<synchronous>, transform_indices = @transform_0, window_bounds = array<i64: 16, 32>}, {pipeline_mode = #tpu.pipeline_mode<synchronous>, transform_indices = @transform_1, window_bounds = array<i64: 32, 384>}, {pipeline_mode = #tpu.pipeline_mode<synchronous>, transform_indices = @transform_2, window_bounds = array<i64: 128, 32>}, {pipeline_mode = #tpu.pipeline_mode<synchronous>, transform_indices = @transform_3, window_bounds = array<i64: 8, 128>}, {pipeline_mode = #tpu.pipeline_mode<synchronous>, transform_indices = @transform_4, window_bounds = array<i64: 16, 32>}]} {
    %c0 = arith.constant 0 : index
    %c0_0 = arith.constant 0 : index
    %0 = vector.load %arg1[%c0, %c0_0] : memref<16x32xf32, #tpu.memory_space<vmem>>, vector<16x32xf32>
    %c0_1 = arith.constant 0 : index
    %c0_2 = arith.constant 0 : index
    %1 = vector.load %arg2[%c0_1, %c0_2] : memref<32x384xf32, #tpu.memory_space<vmem>>, vector<32x384xf32>
    %2 = vector.extract_strided_slice %1 {offsets = [0, 0], sizes = [32, 96], strides = [1, 1]} : vector<32x384xf32> to vector<32x96xf32>
    %3 = vector.extract_strided_slice %1 {offsets = [0, 128], sizes = [32, 32], strides = [1, 1]} : vector<32x384xf32> to vector<32x32xf32>
    %4 = vector.extract_strided_slice %1 {offsets = [0, 256], sizes = [32, 128], strides = [1, 1]} : vector<32x384xf32> to vector<32x128xf32>
    %c0_3 = arith.constant 0 : index
    %c0_4 = arith.constant 0 : index
    %5 = vector.load %arg4[%c0_3, %c0_4] : memref<8x128xf32, #tpu.memory_space<vmem>>, vector<8x128xf32>
    %6 = vector.extract_strided_slice %5 {offsets = [0, 0], sizes = [1, 96], strides = [1, 1]} : vector<8x128xf32> to vector<1x96xf32>
    %7 = vector.extract_strided_slice %5 {offsets = [1, 0], sizes = [1, 128], strides = [1, 1]} : vector<8x128xf32> to vector<1x128xf32>
    %8 = vector.extract_strided_slice %5 {offsets = [2, 0], sizes = [1, 32], strides = [1, 1]} : vector<8x128xf32> to vector<1x32xf32>
    %9 = vector.extract_strided_slice %5 {offsets = [3, 0], sizes = [1, 32], strides = [1, 1]} : vector<8x128xf32> to vector<1x32xf32>
    %10 = vector.extract_strided_slice %5 {offsets = [4, 0], sizes = [1, 32], strides = [1, 1]} : vector<8x128xf32> to vector<1x32xf32>
    %11 = vector.extract_strided_slice %5 {offsets = [5, 0], sizes = [1, 32], strides = [1, 1]} : vector<8x128xf32> to vector<1x32xf32>
    %12 = vector.extract_strided_slice %5 {offsets = [6, 0], sizes = [1, 32], strides = [1, 1]} : vector<8x128xf32> to vector<1x32xf32>
    %13 = vector.extract_strided_slice %5 {offsets = [7, 0], sizes = [1, 32], strides = [1, 1]} : vector<8x128xf32> to vector<1x32xf32>
    %cst = arith.constant dense<0.000000e+00> : vector<16xf32>
    %14 = vector.multi_reduction <add>, %0, %cst [1] : vector<16x32xf32> to vector<16xf32>
    %15 = vector.shape_cast %14 : vector<16xf32> to vector<16x1xf32>
    %cst_5 = arith.constant 3.200000e+01 : f32
    %16 = vector.broadcast %cst_5 : f32 to vector<16x1xf32>
    %17 = arith.divf %15, %16 : vector<16x1xf32>
    %18 = vector.broadcast %17 : vector<16x1xf32> to vector<16x32xf32>
    %19 = arith.subf %0, %18 : vector<16x32xf32>
    %20 = arith.mulf %19, %19 : vector<16x32xf32>
    %cst_6 = arith.constant dense<0.000000e+00> : vector<16xf32>
    %21 = vector.multi_reduction <add>, %20, %cst_6 [1] : vector<16x32xf32> to vector<16xf32>
    %22 = vector.shape_cast %21 : vector<16xf32> to vector<16x1xf32>
    %cst_7 = arith.constant 3.200000e+01 : f32
    %23 = vector.broadcast %cst_7 : f32 to vector<16x1xf32>
    %24 = arith.divf %22, %23 : vector<16x1xf32>
    %25 = vector.broadcast %17 : vector<16x1xf32> to vector<16x32xf32>
    %26 = arith.subf %0, %25 : vector<16x32xf32>
    %cst_8 = arith.constant 9.99999974E-6 : f32
    %27 = vector.broadcast %cst_8 : f32 to vector<16x1xf32>
    %28 = arith.addf %24, %27 : vector<16x1xf32>
    %29 = math.rsqrt %28 : vector<16x1xf32>
    %30 = vector.broadcast %29 : vector<16x1xf32> to vector<16x32xf32>
    %31 = arith.mulf %26, %30 : vector<16x32xf32>
    %32 = vector.broadcast %8 : vector<1x32xf32> to vector<16x32xf32>
    %33 = arith.mulf %31, %32 : vector<16x32xf32>
    %34 = vector.broadcast %9 : vector<1x32xf32> to vector<16x32xf32>
    %35 = arith.addf %33, %34 : vector<16x32xf32>
    %cst_9 = arith.constant dense<0.000000e+00> : vector<16x96xf32>
    %36 = tpu.matmul %35, %2, %cst_9 {dimension_numbers = #tpu.dot_dimension_numbers<[1], [0], [0], [1], [0, 0, 1, 1], [], []>} : vector<16x32xf32>, vector<32x96xf32>, vector<16x96xf32> -> vector<16x96xf32>
    %37 = vector.broadcast %6 : vector<1x96xf32> to vector<16x96xf32>
    %38 = arith.addf %36, %37 : vector<16x96xf32>
    %39 = vector.shape_cast %38 : vector<16x96xf32> to vector<2x8x96xf32>
    %cst_10 = arith.constant 0.000000e+00 : f32
    %40 = vector.broadcast %cst_10 : f32 to vector<16x32xf32>
    %41 = vector.extract_strided_slice %39 {offsets = [0, 0, 0], sizes = [2, 8, 8], strides = [1, 1, 1]} : vector<2x8x96xf32> to vector<2x8x8xf32>
    %42 = vector.extract_strided_slice %39 {offsets = [0, 0, 8], sizes = [2, 8, 8], strides = [1, 1, 1]} : vector<2x8x96xf32> to vector<2x8x8xf32>
    %43 = vector.extract_strided_slice %39 {offsets = [0, 0, 16], sizes = [2, 8, 8], strides = [1, 1, 1]} : vector<2x8x96xf32> to vector<2x8x8xf32>
    "tpu.trace_start"() <{level = 10 : i32, message = "btd,bsd->bts"}> : () -> ()
    %cst_11 = arith.constant dense<0.000000e+00> : vector<2x8x8xf32>
    %44 = tpu.matmul %41, %42, %cst_11 {dimension_numbers = #tpu.dot_dimension_numbers<[2], [2], [1], [1], [0, 0, 0, 1, 1, 1], [0], [0]>} : vector<2x8x8xf32>, vector<2x8x8xf32>, vector<2x8x8xf32> -> vector<2x8x8xf32>
    "tpu.trace_stop"() : () -> ()
    %cst_12 = arith.constant dense<0xFF800000> : vector<2x8xf32>
    %45 = vector.multi_reduction <maximumf>, %44, %cst_12 [2] : vector<2x8x8xf32> to vector<2x8xf32>
    %46 = vector.shape_cast %45 : vector<2x8xf32> to vector<2x8x1xf32>
    %47 = vector.broadcast %46 : vector<2x8x1xf32> to vector<2x8x8xf32>
    %48 = arith.subf %44, %47 : vector<2x8x8xf32>
    %49 = math.exp %48 : vector<2x8x8xf32>
    %cst_13 = arith.constant dense<0.000000e+00> : vector<2x8xf32>
    %50 = vector.multi_reduction <add>, %49, %cst_13 [2] : vector<2x8x8xf32> to vector<2x8xf32>
    %51 = vector.shape_cast %50 : vector<2x8xf32> to vector<2x8x1xf32>
    %52 = vector.broadcast %51 : vector<2x8x1xf32> to vector<2x8x8xf32>
    %53 = arith.divf %49, %52 : vector<2x8x8xf32>
    "tpu.trace_start"() <{level = 10 : i32, message = "bts,bsd->btd"}> : () -> ()
    %cst_14 = arith.constant dense<0.000000e+00> : vector<2x8x8xf32>
    %54 = tpu.matmul %53, %43, %cst_14 {dimension_numbers = #tpu.dot_dimension_numbers<[2], [1], [1], [2], [0, 0, 0, 1, 1, 2], [0], [0]>} : vector<2x8x8xf32>, vector<2x8x8xf32>, vector<2x8x8xf32> -> vector<2x8x8xf32>
    "tpu.trace_stop"() : () -> ()
    %55 = vector.shape_cast %54 : vector<2x8x8xf32> to vector<16x8xf32>
    %56 = vector.extract_strided_slice %3 {offsets = [0, 0], sizes = [8, 32], strides = [1, 1]} : vector<32x32xf32> to vector<8x32xf32>
    %cst_15 = arith.constant dense<0.000000e+00> : vector<16x32xf32>
    %57 = tpu.matmul %55, %56, %cst_15 {dimension_numbers = #tpu.dot_dimension_numbers<[1], [0], [0], [1], [0, 0, 1, 1], [], []>} : vector<16x8xf32>, vector<8x32xf32>, vector<16x32xf32> -> vector<16x32xf32>
    %58 = arith.addf %40, %57 : vector<16x32xf32>
    %59 = vector.extract_strided_slice %39 {offsets = [0, 0, 24], sizes = [2, 8, 8], strides = [1, 1, 1]} : vector<2x8x96xf32> to vector<2x8x8xf32>
    %60 = vector.extract_strided_slice %39 {offsets = [0, 0, 32], sizes = [2, 8, 8], strides = [1, 1, 1]} : vector<2x8x96xf32> to vector<2x8x8xf32>
    %61 = vector.extract_strided_slice %39 {offsets = [0, 0, 40], sizes = [2, 8, 8], strides = [1, 1, 1]} : vector<2x8x96xf32> to vector<2x8x8xf32>
    "tpu.trace_start"() <{level = 10 : i32, message = "btd,bsd->bts"}> : () -> ()
    %cst_16 = arith.constant dense<0.000000e+00> : vector<2x8x8xf32>
    %62 = tpu.matmul %59, %60, %cst_16 {dimension_numbers = #tpu.dot_dimension_numbers<[2], [2], [1], [1], [0, 0, 0, 1, 1, 1], [0], [0]>} : vector<2x8x8xf32>, vector<2x8x8xf32>, vector<2x8x8xf32> -> vector<2x8x8xf32>
    "tpu.trace_stop"() : () -> ()
    %cst_17 = arith.constant dense<0xFF800000> : vector<2x8xf32>
    %63 = vector.multi_reduction <maximumf>, %62, %cst_17 [2] : vector<2x8x8xf32> to vector<2x8xf32>
    %64 = vector.shape_cast %63 : vector<2x8xf32> to vector<2x8x1xf32>
    %65 = vector.broadcast %64 : vector<2x8x1xf32> to vector<2x8x8xf32>
    %66 = arith.subf %62, %65 : vector<2x8x8xf32>
    %67 = math.exp %66 : vector<2x8x8xf32>
    %cst_18 = arith.constant dense<0.000000e+00> : vector<2x8xf32>
    %68 = vector.multi_reduction <add>, %67, %cst_18 [2] : vector<2x8x8xf32> to vector<2x8xf32>
    %69 = vector.shape_cast %68 : vector<2x8xf32> to vector<2x8x1xf32>
    %70 = vector.broadcast %69 : vector<2x8x1xf32> to vector<2x8x8xf32>
    %71 = arith.divf %67, %70 : vector<2x8x8xf32>
    "tpu.trace_start"() <{level = 10 : i32, message = "bts,bsd->btd"}> : () -> ()
    %cst_19 = arith.constant dense<0.000000e+00> : vector<2x8x8xf32>
    %72 = tpu.matmul %71, %61, %cst_19 {dimension_numbers = #tpu.dot_dimension_numbers<[2], [1], [1], [2], [0, 0, 0, 1, 1, 2], [0], [0]>} : vector<2x8x8xf32>, vector<2x8x8xf32>, vector<2x8x8xf32> -> vector<2x8x8xf32>
    "tpu.trace_stop"() : () -> ()
    %73 = vector.shape_cast %72 : vector<2x8x8xf32> to vector<16x8xf32>
    %74 = vector.extract_strided_slice %3 {offsets = [8, 0], sizes = [8, 32], strides = [1, 1]} : vector<32x32xf32> to vector<8x32xf32>
    %cst_20 = arith.constant dense<0.000000e+00> : vector<16x32xf32>
    %75 = tpu.matmul %73, %74, %cst_20 {dimension_numbers = #tpu.dot_dimension_numbers<[1], [0], [0], [1], [0, 0, 1, 1], [], []>} : vector<16x8xf32>, vector<8x32xf32>, vector<16x32xf32> -> vector<16x32xf32>
    %76 = arith.addf %58, %75 : vector<16x32xf32>
    %77 = vector.extract_strided_slice %39 {offsets = [0, 0, 48], sizes = [2, 8, 8], strides = [1, 1, 1]} : vector<2x8x96xf32> to vector<2x8x8xf32>
    %78 = vector.extract_strided_slice %39 {offsets = [0, 0, 56], sizes = [2, 8, 8], strides = [1, 1, 1]} : vector<2x8x96xf32> to vector<2x8x8xf32>
    %79 = vector.extract_strided_slice %39 {offsets = [0, 0, 64], sizes = [2, 8, 8], strides = [1, 1, 1]} : vector<2x8x96xf32> to vector<2x8x8xf32>
    "tpu.trace_start"() <{level = 10 : i32, message = "btd,bsd->bts"}> : () -> ()
    %cst_21 = arith.constant dense<0.000000e+00> : vector<2x8x8xf32>
    %80 = tpu.matmul %77, %78, %cst_21 {dimension_numbers = #tpu.dot_dimension_numbers<[2], [2], [1], [1], [0, 0, 0, 1, 1, 1], [0], [0]>} : vector<2x8x8xf32>, vector<2x8x8xf32>, vector<2x8x8xf32> -> vector<2x8x8xf32>
    "tpu.trace_stop"() : () -> ()
    %cst_22 = arith.constant dense<0xFF800000> : vector<2x8xf32>
    %81 = vector.multi_reduction <maximumf>, %80, %cst_22 [2] : vector<2x8x8xf32> to vector<2x8xf32>
    %82 = vector.shape_cast %81 : vector<2x8xf32> to vector<2x8x1xf32>
    %83 = vector.broadcast %82 : vector<2x8x1xf32> to vector<2x8x8xf32>
    %84 = arith.subf %80, %83 : vector<2x8x8xf32>
    %85 = math.exp %84 : vector<2x8x8xf32>
    %cst_23 = arith.constant dense<0.000000e+00> : vector<2x8xf32>
    %86 = vector.multi_reduction <add>, %85, %cst_23 [2] : vector<2x8x8xf32> to vector<2x8xf32>
    %87 = vector.shape_cast %86 : vector<2x8xf32> to vector<2x8x1xf32>
    %88 = vector.broadcast %87 : vector<2x8x1xf32> to vector<2x8x8xf32>
    %89 = arith.divf %85, %88 : vector<2x8x8xf32>
    "tpu.trace_start"() <{level = 10 : i32, message = "bts,bsd->btd"}> : () -> ()
    %cst_24 = arith.constant dense<0.000000e+00> : vector<2x8x8xf32>
    %90 = tpu.matmul %89, %79, %cst_24 {dimension_numbers = #tpu.dot_dimension_numbers<[2], [1], [1], [2], [0, 0, 0, 1, 1, 2], [0], [0]>} : vector<2x8x8xf32>, vector<2x8x8xf32>, vector<2x8x8xf32> -> vector<2x8x8xf32>
    "tpu.trace_stop"() : () -> ()
    %91 = vector.shape_cast %90 : vector<2x8x8xf32> to vector<16x8xf32>
    %92 = vector.extract_strided_slice %3 {offsets = [16, 0], sizes = [8, 32], strides = [1, 1]} : vector<32x32xf32> to vector<8x32xf32>
    %cst_25 = arith.constant dense<0.000000e+00> : vector<16x32xf32>
    %93 = tpu.matmul %91, %92, %cst_25 {dimension_numbers = #tpu.dot_dimension_numbers<[1], [0], [0], [1], [0, 0, 1, 1], [], []>} : vector<16x8xf32>, vector<8x32xf32>, vector<16x32xf32> -> vector<16x32xf32>
    %94 = arith.addf %76, %93 : vector<16x32xf32>
    %95 = vector.extract_strided_slice %39 {offsets = [0, 0, 72], sizes = [2, 8, 8], strides = [1, 1, 1]} : vector<2x8x96xf32> to vector<2x8x8xf32>
    %96 = vector.extract_strided_slice %39 {offsets = [0, 0, 80], sizes = [2, 8, 8], strides = [1, 1, 1]} : vector<2x8x96xf32> to vector<2x8x8xf32>
    %97 = vector.extract_strided_slice %39 {offsets = [0, 0, 88], sizes = [2, 8, 8], strides = [1, 1, 1]} : vector<2x8x96xf32> to vector<2x8x8xf32>
    "tpu.trace_start"() <{level = 10 : i32, message = "btd,bsd->bts"}> : () -> ()
    %cst_26 = arith.constant dense<0.000000e+00> : vector<2x8x8xf32>
    %98 = tpu.matmul %95, %96, %cst_26 {dimension_numbers = #tpu.dot_dimension_numbers<[2], [2], [1], [1], [0, 0, 0, 1, 1, 1], [0], [0]>} : vector<2x8x8xf32>, vector<2x8x8xf32>, vector<2x8x8xf32> -> vector<2x8x8xf32>
    "tpu.trace_stop"() : () -> ()
    %cst_27 = arith.constant dense<0xFF800000> : vector<2x8xf32>
    %99 = vector.multi_reduction <maximumf>, %98, %cst_27 [2] : vector<2x8x8xf32> to vector<2x8xf32>
    %100 = vector.shape_cast %99 : vector<2x8xf32> to vector<2x8x1xf32>
    %101 = vector.broadcast %100 : vector<2x8x1xf32> to vector<2x8x8xf32>
    %102 = arith.subf %98, %101 : vector<2x8x8xf32>
    %103 = math.exp %102 : vector<2x8x8xf32>
    %cst_28 = arith.constant dense<0.000000e+00> : vector<2x8xf32>
    %104 = vector.multi_reduction <add>, %103, %cst_28 [2] : vector<2x8x8xf32> to vector<2x8xf32>
    %105 = vector.shape_cast %104 : vector<2x8xf32> to vector<2x8x1xf32>
    %106 = vector.broadcast %105 : vector<2x8x1xf32> to vector<2x8x8xf32>
    %107 = arith.divf %103, %106 : vector<2x8x8xf32>
    "tpu.trace_start"() <{level = 10 : i32, message = "bts,bsd->btd"}> : () -> ()
    %cst_29 = arith.constant dense<0.000000e+00> : vector<2x8x8xf32>
    %108 = tpu.matmul %107, %97, %cst_29 {dimension_numbers = #tpu.dot_dimension_numbers<[2], [1], [1], [2], [0, 0, 0, 1, 1, 2], [0], [0]>} : vector<2x8x8xf32>, vector<2x8x8xf32>, vector<2x8x8xf32> -> vector<2x8x8xf32>
    "tpu.trace_stop"() : () -> ()
    %109 = vector.shape_cast %108 : vector<2x8x8xf32> to vector<16x8xf32>
    %110 = vector.extract_strided_slice %3 {offsets = [24, 0], sizes = [8, 32], strides = [1, 1]} : vector<32x32xf32> to vector<8x32xf32>
    %cst_30 = arith.constant dense<0.000000e+00> : vector<16x32xf32>
    %111 = tpu.matmul %109, %110, %cst_30 {dimension_numbers = #tpu.dot_dimension_numbers<[1], [0], [0], [1], [0, 0, 1, 1], [], []>} : vector<16x8xf32>, vector<8x32xf32>, vector<16x32xf32> -> vector<16x32xf32>
    %112 = arith.addf %94, %111 : vector<16x32xf32>
    %113 = vector.broadcast %12 : vector<1x32xf32> to vector<16x32xf32>
    %114 = arith.addf %112, %113 : vector<16x32xf32>
    %115 = arith.addf %0, %114 : vector<16x32xf32>
    %cst_31 = arith.constant dense<0.000000e+00> : vector<16xf32>
    %116 = vector.multi_reduction <add>, %115, %cst_31 [1] : vector<16x32xf32> to vector<16xf32>
    %117 = vector.shape_cast %116 : vector<16xf32> to vector<16x1xf32>
    %cst_32 = arith.constant 3.200000e+01 : f32
    %118 = vector.broadcast %cst_32 : f32 to vector<16x1xf32>
    %119 = arith.divf %117, %118 : vector<16x1xf32>
    %120 = vector.broadcast %119 : vector<16x1xf32> to vector<16x32xf32>
    %121 = arith.subf %115, %120 : vector<16x32xf32>
    %122 = arith.mulf %121, %121 : vector<16x32xf32>
    %cst_33 = arith.constant dense<0.000000e+00> : vector<16xf32>
    %123 = vector.multi_reduction <add>, %122, %cst_33 [1] : vector<16x32xf32> to vector<16xf32>
    %124 = vector.shape_cast %123 : vector<16xf32> to vector<16x1xf32>
    %cst_34 = arith.constant 3.200000e+01 : f32
    %125 = vector.broadcast %cst_34 : f32 to vector<16x1xf32>
    %126 = arith.divf %124, %125 : vector<16x1xf32>
    %127 = vector.broadcast %119 : vector<16x1xf32> to vector<16x32xf32>
    %128 = arith.subf %115, %127 : vector<16x32xf32>
    %cst_35 = arith.constant 9.99999974E-6 : f32
    %129 = vector.broadcast %cst_35 : f32 to vector<16x1xf32>
    %130 = arith.addf %126, %129 : vector<16x1xf32>
    %131 = math.rsqrt %130 : vector<16x1xf32>
    %132 = vector.broadcast %131 : vector<16x1xf32> to vector<16x32xf32>
    %133 = arith.mulf %128, %132 : vector<16x32xf32>
    %134 = vector.broadcast %10 : vector<1x32xf32> to vector<16x32xf32>
    %135 = arith.mulf %133, %134 : vector<16x32xf32>
    %136 = vector.broadcast %11 : vector<1x32xf32> to vector<16x32xf32>
    %137 = arith.addf %135, %136 : vector<16x32xf32>
    %cst_36 = arith.constant dense<0.000000e+00> : vector<16x128xf32>
    %138 = tpu.matmul %137, %4, %cst_36 {dimension_numbers = #tpu.dot_dimension_numbers<[1], [0], [0], [1], [0, 0, 1, 1], [], []>} : vector<16x32xf32>, vector<32x128xf32>, vector<16x128xf32> -> vector<16x128xf32>
    %139 = vector.broadcast %7 : vector<1x128xf32> to vector<16x128xf32>
    %140 = arith.addf %138, %139 : vector<16x128xf32>
    %cst_37 = arith.constant 5.000000e-01 : f32
    %141 = vector.broadcast %cst_37 : f32 to vector<16x128xf32>
    %142 = arith.mulf %141, %140 : vector<16x128xf32>
    %cst_38 = arith.constant 0.707106769 : f32
    %143 = vector.broadcast %cst_38 : f32 to vector<16x128xf32>
    %144 = arith.mulf %140, %143 : vector<16x128xf32>
    %145 = math.erf %144 : vector<16x128xf32>
    %cst_39 = arith.constant 1.000000e+00 : f32
    %146 = vector.broadcast %cst_39 : f32 to vector<16x128xf32>
    %147 = arith.addf %146, %145 : vector<16x128xf32>
    %148 = arith.mulf %142, %147 : vector<16x128xf32>
    %c0_40 = arith.constant 0 : index
    %c0_41 = arith.constant 0 : index
    %149 = vector.load %arg3[%c0_40, %c0_41] : memref<128x32xf32, #tpu.memory_space<vmem>>, vector<128x32xf32>
    %cst_42 = arith.constant dense<0.000000e+00> : vector<16x32xf32>
    %150 = tpu.matmul %148, %149, %cst_42 {dimension_numbers = #tpu.dot_dimension_numbers<[1], [0], [0], [1], [0, 0, 1, 1], [], []>} : vector<16x128xf32>, vector<128x32xf32>, vector<16x32xf32> -> vector<16x32xf32>
    %151 = vector.broadcast %13 : vector<1x32xf32> to vector<16x32xf32>
    %152 = arith.addf %150, %151 : vector<16x32xf32>
    %153 = arith.addf %115, %152 : vector<16x32xf32>
    %c0_43 = arith.constant 0 : index
    %c0_44 = arith.constant 0 : index
    %154 = vector.load %arg5[%c0_43, %c0_44] : memref<16x32xf32, #tpu.memory_space<vmem>>, vector<16x32xf32>
    tpu.vector_store %arg5[%c0_43, %c0_44], %153 {strides = array<i32>} : memref<16x32xf32, #tpu.memory_space<vmem>>, vector<16x32xf32>,
    return
  }
  func.func @transform_0(%arg0: i32) -> (i32, i32) {
    %c0_i32 = arith.constant 0 : i32
    %c0_i32_0 = arith.constant 0 : i32
    %c0_i32_1 = arith.constant 0 : i32
    return %c0_i32, %c0_i32_0 : i32, i32
  }
  func.func @transform_1(%arg0: i32) -> (i32, i32) {
    %c0_i32 = arith.constant 0 : i32
    %c0_i32_0 = arith.constant 0 : i32
    %c0_i32_1 = arith.constant 0 : i32
    return %c0_i32, %c0_i32_0 : i32, i32
  }
  func.func @transform_2(%arg0: i32) -> (i32, i32) {
    %c0_i32 = arith.constant 0 : i32
    %c0_i32_0 = arith.constant 0 : i32
    %c0_i32_1 = arith.constant 0 : i32
    return %c0_i32, %c0_i32_0 : i32, i32
  }
  func.func @transform_3(%arg0: i32) -> (i32, i32) {
    %c0_i32 = arith.constant 0 : i32
    %c0_i32_0 = arith.constant 0 : i32
    %c0_i32_1 = arith.constant 0 : i32
    return %c0_i32, %c0_i32_0 : i32, i32
  }
  func.func @transform_4(%arg0: i32) -> (i32, i32) {
    %c0_i32 = arith.constant 0 : i32
    %c0_i32_0 = arith.constant 0 : i32
    %c0_i32_1 = arith.constant 0 : i32
    return %c0_i32, %c0_i32_0 : i32, i32
  }
}

</mosaic_0001>

<bundles_post_ra>
// kernel: transformer_block.1
= control target key start
LH: loop header
LB: loop body
LE: loop exit
PB: predicated region body
PF: predicated region fallthrough
CT: control target
= control target key end

     0   :  { %vm32_vm0 = vcmask 261120   ;;  %v60_v22 = vlaneseq  ;;  %v2426_v41 = vmov 0.0   ;;  %vm2427_vm1 = vmmov 0   ;;  %s2429_s28 = smov 112   ;;  %s2430_s29 = smov 96   ;;  %s2755_s0 = inlined_call_operand.vmem [shape: f32[16,32], index: 0, kind: input, shape index: {}, may-alias: {0,4}]   ;;  %s2756_s1 = inlined_call_operand.vmem [shape: f32[32,384], index: 1, kind: input, shape index: {}]   ;;  %s2757_s3 = inlined_call_operand.vmem [shape: f32[8,128], index: 3, kind: input, shape index: {}]   ;;  %s2758_s2 = inlined_call_operand.vmem [shape: f32[128,32], index: 2, kind: input, shape index: {}]   ;;  %s2759_s4 = inlined_call_operand.vmem [shape: f32[16,32], index: 4, kind: output, shape index: {}, may-alias: {0,4}]  }
   0x1   :  { %v2467_v0 = vld [vmem:[%s2755_s0] sm:$0xff]  ;;  %v2472_v1 = vld [vmem:[%s2755_s0 + $0x8] sm:$0xff]  ;;  %v22_v15 = vld [vmem:[%s2756_s1 + $0x18] sm:$0xff]  ;;  %2199 = vmatprep.subr.mxu0 %v2426_v41  ;;  %2201 = vmatprep.mubr.msk.f32.mxu0 %vm2427_vm1, %v2426_v41  ;;  %vm160_vm2 = vcmask 64512   ;;  %s2431_s30 = smov 104   ;;  %s2432_s5 = smov 72  }
   0x2   :  { %v33_v2 = vsel %vm32_vm0, %v2467_v0, 0.0  ;;  %v36_v3 = vsel %vm32_vm0, %v2472_v1, 0.0  ;;  %v19_v14 = vld [vmem:[%s2756_s1] sm:$0xff]  ;;  %v25_v16 = vld [vmem:[%s2756_s1 + $0x30] sm:$0xff]  ;;  %v28_v18 = vld [vmem:[%s2756_s1 + $0x48] sm:$0xff]  ;;  %v2494_v26 = vshrl.u32 %v60_v22, 7 }
   0x3   :  { %34 = vadd.xlane.f32.xlu0 %v33_v2  ;;  %v2315_v17 = vpack.c.bf16 %v22_v15, %v19_v14  ;;  %v2319_v19 = vpack.c.bf16 %v28_v18, %v25_v16  ;;  %v2500_v29 = vld [vmem:[%s2757_s3] sm:$0xff]  ;;  %s2428_s3 = smov 120   ;;  %s2433_s6 = smov 88  }
   0x4   :  { %v62_v28 = vsub.s32 2, %v2494_v26  ;;  %v68_v30 = vsub.s32 3, %v2494_v26  ;;  %v74_v42 = vsub.s32 0, %v2494_v26  ;;  %s2434_s7 = smov 80   ;;  %s2435_s8 = smov 64  }
   0x5   :  { %2316 = vmatprep.subr.bf16.mxu1 %v2315_v17  ;;  %s2436_s9 = smov 48   ;;  %s2437_s10 = smov 56  }
   0x6   :  { %2318 = vmatpush3.bf16.msra.mxu1 %v2315_v17  ;;  %v63_v31 = vrot.slane %v2500_v29, %v62_v28  ;;  %v69_v34 = vrot.slane %v2500_v29, %v68_v30  ;;  %v75_v43 = vrot.slane %v2500_v29, %v74_v42  ;;  %s2438_s17 = smov 40  }
   0x7   :  { %37 = vadd.xlane.f32.xlu0 %v36_v3  ;;  %2320 = vmatprep.subr.bf16.mxu1 %v2319_v19 }
   0xa   :  { %2322 = vmatpush3.bf16.msra.mxu1 %v2319_v19 }
   0xb   :  { %2169 = vmatprep.subr.mxu1 %v2426_v41 }
  0x90   :  { %v35_v4 = vpop.xlane.xlu0 %34 }
  0x91   :  { %v40_v5 = vmul.f32 0.03125, %v35_v4 }
  0x93   :  { %v42_v6 = vsub.f32 %v2467_v0, %v40_v5 }
  0x94   :  { %v38_v7 = vpop.xlane.xlu0 %37 }
  0x95   :  { %v41_v8 = vmul.f32 0.03125, %v38_v7  ;;  %v44_v9 = vmul.f32 %v42_v6, %v42_v6 }
  0x97   :  { %v43_v10 = vsub.f32 %v2472_v1, %v41_v8  ;;  %v46_v11 = vsel %vm32_vm0, %v44_v9, 0.0 }
  0x98   :  { %47 = vadd.xlane.f32.xlu1 %v46_v11 }
  0x99   :  { %v45_v12 = vmul.f32 %v43_v10, %v43_v10 }
  0x9b   :  { %v49_v13 = vsel %vm32_vm0, %v45_v12, 0.0 }
  0x9c   :  { %50 = vadd.xlane.f32.xlu1 %v49_v13 }
 0x125   :  { %v48_v20 = vpop.xlane.xlu1 %47 }
 0x126   :  { %v52_v21 = vmul.f32 0.03125, %v48_v20 }
 0x128   :  { %v54_v23 = vadd.f32 1e-05, %v52_v21 }
 0x129   :  { %v51_v24 = vpop.xlane.xlu1 %50 }
 0x12a   :  { %2382 = vrsqrt.f32 %v54_v23  ;;  %v53_v25 = vmul.f32 0.03125, %v51_v24 }
 0x12c   :  { %v55_v27 = vadd.f32 1e-05, %v53_v25 }
 0x12e   :  { %2384 = vrsqrt.f32 %v55_v27 }
 0x134   :  { %v2383_v32 = vpop.eup %2382 }
 0x135   :  { %v58_v33 = vmul.f32 %v2383_v32, %v42_v6 }
 0x137   :  { %v64_v35 = vmul.f32 %v63_v31, %v58_v33 }
 0x138   :  { %v2385_v36 = vpop.eup %2384 }
 0x139   :  { %v59_v37 = vmul.f32 %v2385_v36, %v43_v10  ;;  %v70_v38 = vadd.f32 %v69_v34, %v64_v35 }
 0x13b   :  { %v65_v39 = vmul.f32 %v63_v31, %v59_v37  ;;  %2166 = vmatprep.mubr.msk.f32.mxu1 %vm32_vm0, %v70_v38 }
 0x13d   :  { %v71_v40 = vadd.f32 %v69_v34, %v65_v39 }
 0x13f   :  { %2167 = vmatmul.mubr.msk.f32.vlgmr.msra.gmra.mrb[0].mxu1 %vm32_vm0, %v71_v40 }
 0x140   :  { %2171 = vmatprep.mubr.msk.f32.mxu1 %vm2427_vm1, %v2426_v41 }
 0x212   :  { %v2168_v44 = vpop.f32.mrb[0].mxu1 }
 0x213   :  { %v2515_v45 = vadd.f32 %v2168_v44, %v75_v43  ;;  %v148_v46 = vpop.f32.mrb[1].mxu1 }
 0x214   :  { %v2517_v47 = vadd.f32 %v148_v46, %v75_v43 }
 0x215   :  { %236 = vrot.lane.b32.xlu1 %v2515_v45, %s2428_s3 }
 0x216   :  { %158 = vrot.lane.b32.xlu0 %v2517_v47, %s2428_s3 }
 0x287   :  { %v237_v49 = vpop.permute.xlu1 %236 }
 0x288   :  { %v159_v48 = vpop.permute.xlu0 %158 }
 0x289   :  { %2170 = vmatpush3.xpose.msk.msra.mxu1 %vm160_vm2, %v159_v48 }
 0x28a   :  { %2174 = vmatprep.subr.mxu1 %v2426_v41 }
 0x28c   :  { %2172 = vmatmul.mubr.msk.f32.vlgmr.msra.gmra.mrb[2].mxu1 %vm160_vm2, %v2517_v47 }
 0x28d   :  { %2175 = vmatpush3.xpose.msk.msra.mxu1 %vm160_vm2, %v237_v49  ;;  %2176 = vmatprep.mubr.msk.f32.mxu1 %vm2427_vm1, %v2426_v41 }
 0x28e   :  { %2179 = vmatprep.subr.mxu1 %v2426_v41 }
 0x290   :  { %2177 = vmatmul.mubr.msk.f32.vlgmr.msra.gmra.mrb[4].mxu1 %vm160_vm2, %v2515_v45 }
 0x291   :  { %2181 = vmatprep.mubr.msk.f32.mxu1 %vm2427_vm1, %v2426_v41 }
 0x35f   :  { %v231_v50 = vpop.f32.mrb[2].mxu1 }
 0x360   :  { %v2173_v51 = vpop.f32.mrb[3].mxu1  ;;  %v312_v52 = vsel %vm160_vm2, %v231_v50, -inf }
 0x361   :  { %313 = vmax.xlane.f32.xlu1 %v312_v52 }
 0x363   :  { %v308_v53 = vpop.f32.mrb[4].mxu1 }
 0x364   :  { %v2178_v54 = vpop.f32.mrb[5].mxu1  ;;  %v315_v55 = vsel %vm160_vm2, %v308_v53, -inf }
 0x365   :  { %316 = vmax.xlane.f32.xlu0 %v315_v55 }
 0x372   :  { %410 = vrot.lane.b32.xlu1 %v2515_v45, %s2429_s28 }
 0x376   :  { %488 = vrot.lane.b32.xlu1 %v2517_v47, %s2430_s29 }
 0x37a   :  { %486 = vrot.lane.b32.xlu1 %v2517_v47, %s2431_s30 }
 0x3ee   :  { %v314_v56 = vpop.xlane.xlu1 %313 }
 0x3ef   :  { %v318_v57 = vsub.f32 %v231_v50, %v314_v56 }
 0x3f1   :  { %v320_v58 = vmul.f32 1.442695, %v318_v57 }
 0x3f2   :  { %v317_v59 = vpop.xlane.xlu0 %316  ;;  %v411_v4 = vpop.permute.xlu1 %410 }
 0x3f3   :  { %2386 = vpow2.f32 %v320_v58  ;;  %v319_v60 = vsub.f32 %v308_v53, %v317_v59 }
 0x3f5   :  { %v322_v61 = vmul.f32 1.442695, %v319_v60 }
 0x3f6   :  { %v489_v5 = vpop.permute.xlu1 %488 }
 0x3f7   :  { %2388 = vpow2.f32 %v322_v61 }
 0x3fa   :  { %v487_v6 = vpop.permute.xlu1 %486 }
 0x3fd   :  { %v2387_v62 = vpop.eup %2386 }
 0x3fe   :  { %v324_v63 = vsel %vm160_vm2, %v2387_v62, 0.0 }
 0x3ff   :  { %325 = vadd.xlane.f32.xlu0 %v324_v63  ;;  %v20_v63 = vld [vmem:[%s2756_s1 + $0x8] sm:$0xff] }
 0x401   :  { %v2389_v2 = vpop.eup %2388 }
 0x402   :  { %v327_v3 = vsel %vm160_vm2, %v2389_v2, 0.0 }
 0x403   :  { %328 = vadd.xlane.f32.xlu1 %v327_v3 }
 0x414   :  { %564 = vrot.lane.b32.xlu1 %v2515_v45, %s2431_s30 }
 0x415   :  { %334 = vrot.lane.b32.xlu0 %v2517_v47, %s2429_s28 }
 0x418   :  { %980 = vrot.lane.b32.xlu1 %v2517_v47, %s2432_s5 }
 0x419   :  { %566 = vrot.lane.b32.xlu0 %v2515_v45, %s2430_s29 }
 0x48c   :  { %v326_v7 = vpop.xlane.xlu0 %325 }
 0x48d   :  { %2390 = vrcp.f32 %v326_v7 }
 0x490   :  { %v329_v8 = vpop.xlane.xlu1 %328  ;;  %v335_v9 = vpop.permute.xlu0 %334 }
 0x491   :  { %2392 = vrcp.f32 %v329_v8  ;;  %2180 = vmatpush3.msra.mxu1 %v335_v9 }
 0x492   :  { %2184 = vmatprep.subr.mxu1 %v2426_v41 }
 0x494   :  { %v567_v14 = vpop.permute.xlu0 %566  ;;  %v565_v15 = vpop.permute.xlu1 %564 }
 0x497   :  { %v2391_v10 = vpop.eup %2390 }
 0x498   :  { %v331_v11 = vmul.f32 %v2391_v10, %v2387_v62  ;;  %v981_v34 = vpop.permute.xlu1 %980  ;;  %v23_v62 = vld [vmem:[%s2756_s1 + $0x20] sm:$0xff] }
 0x49a   :  { %2182 = vmatmul.mubr.msk.f32.vlgmr.msra.gmra.mrb[6].mxu1 %vm160_vm2, %v331_v11 }
 0x49b   :  { %v2393_v12 = vpop.eup %2392  ;;  %2185 = vmatpush3.msra.mxu1 %v411_v4  ;;  %2186 = vmatprep.mubr.msk.f32.mxu1 %vm2427_vm1, %v2426_v41 }
 0x49c   :  { %v333_v13 = vmul.f32 %v2393_v12, %v2389_v2  ;;  %2189 = vmatprep.subr.mxu1 %v2426_v41 }
 0x49e   :  { %2187 = vmatmul.mubr.msk.f32.vlgmr.msra.gmra.mrb[8].mxu1 %vm160_vm2, %v333_v13 }
 0x49f   :  { %2191 = vmatprep.mubr.msk.f32.mxu1 %vm2427_vm1, %v2426_v41 }
 0x4a2   :  { %2190 = vmatpush3.xpose.msk.msra.mxu1 %vm160_vm2, %v489_v5 }
 0x4a3   :  { %2194 = vmatprep.subr.mxu1 %v2426_v41 }
 0x4a5   :  { %2192 = vmatmul.mubr.msk.f32.vlgmr.msra.gmra.mrb[10].mxu1 %vm160_vm2, %v487_v6 }
 0x4a6   :  { %2195 = vmatpush3.xpose.msk.msra.mxu1 %vm160_vm2, %v567_v14  ;;  %2196 = vmatprep.mubr.msk.f32.mxu1 %vm2427_vm1, %v2426_v41 }
 0x4a7   :  { %2204 = vmatprep.subr.mxu1 %v2426_v41 }
 0x4a9   :  { %2197 = vmatmul.mubr.msk.f32.vlgmr.msra.gmra.mrb[12].mxu1 %vm160_vm2, %v565_v15 }
 0x4aa   :  { %2206 = vmatprep.mubr.msk.f32.mxu1 %vm2427_vm1, %v2426_v41 }
 0x56d   :  { %v2563_v16 = vpop.f32.mrb[6].mxu1 }
 0x56e   :  { %v2183_v17 = vpop.f32.mrb[7].mxu1 }
 0x56f   :  { %v26_v17 = vld [vmem:[%s2756_s1 + $0x38] sm:$0xff] }
 0x571   :  { %v2565_v18 = vpop.f32.mrb[8].mxu1 }
 0x572   :  { %v2188_v19 = vpop.f32.mrb[9].mxu1 }
 0x578   :  { %v560_v20 = vpop.f32.mrb[10].mxu1 }
 0x579   :  { %v2193_v21 = vpop.f32.mrb[11].mxu1  ;;  %v642_v33 = vsel %vm160_vm2, %v560_v20, -inf }
 0x57c   :  { %v638_v22 = vpop.f32.mrb[12].mxu1 }
 0x57d   :  { %v2198_v23 = vpop.f32.mrb[13].mxu1  ;;  %v645_v24 = vsel %vm160_vm2, %v638_v22, -inf }
 0x57e   :  { %646 = vmax.xlane.f32.xlu0 %v645_v24 }
 0x594   :  { %740 = vrot.lane.b32.xlu0 %v2515_v45, %s2433_s6 }
 0x598   :  { %978 = vrot.lane.b32.xlu0 %v2517_v47, %s2434_s7 }
 0x59c   :  { %1056 = vrot.lane.b32.xlu0 %v2515_v45, %s2434_s7 }
 0x60b   :  { %v647_v25 = vpop.xlane.xlu0 %646 }
 0x60c   :  { %v649_v27 = vsub.f32 %v638_v22, %v647_v25 }
 0x60e   :  { %v652_v28 = vmul.f32 1.442695, %v649_v27 }
 0x60f   :  { %v741_v30 = vpop.permute.xlu0 %740 }
 0x610   :  { %2394 = vpow2.f32 %v652_v28  ;;  %2205 = vmatpush3.msra.mxu1 %v741_v30 }
 0x611   :  { %2219 = vmatprep.subr.mxu1 %v2426_v41 }
 0x613   :  { %v979_v38 = vpop.permute.xlu0 %978 }
 0x617   :  { %v1057_v40 = vpop.permute.xlu0 %1056 }
 0x61a   :  { %v2395_v31 = vpop.eup %2394 }
 0x61b   :  { %v657_v32 = vsel %vm160_vm2, %v2395_v31, 0.0 }
 0x61c   :  { %658 = vadd.xlane.f32.xlu1 %v657_v32 }
 0x62d   :  { %1058 = vrot.lane.b32.xlu1 %v2515_v45, %s2432_s5 }
 0x651   :  { %643 = vmax.xlane.f32.xlu1 %v642_v33 }
 0x6a9   :  { %v659_v35 = vpop.xlane.xlu1 %658 }
 0x6aa   :  { %2396 = vrcp.f32 %v659_v35 }
 0x6ad   :  { %v1059_v39 = vpop.permute.xlu1 %1058 }
 0x6b4   :  { %v2397_v36 = vpop.eup %2396 }
 0x6b5   :  { %v663_v37 = vmul.f32 %v2397_v36, %v2395_v31 }
 0x6b7   :  { %2207 = vmatmul.mubr.msk.f32.vlgmr.msra.gmra.mrb[14].mxu1 %vm160_vm2, %v663_v37 }
 0x6b8   :  { %2220 = vmatpush3.xpose.msk.msra.mxu1 %vm160_vm2, %v981_v34  ;;  %2221 = vmatprep.mubr.msk.f32.mxu1 %vm2427_vm1, %v2426_v41 }
 0x6b9   :  { %2224 = vmatprep.subr.mxu1 %v2426_v41 }
 0x6bb   :  { %2222 = vmatmul.mubr.msk.f32.vlgmr.msra.gmra.mrb[16].mxu1 %vm160_vm2, %v979_v38 }
 0x6bc   :  { %2225 = vmatpush3.xpose.msk.msra.mxu1 %vm160_vm2, %v1059_v39  ;;  %2226 = vmatprep.mubr.msk.f32.mxu1 %vm2427_vm1, %v2426_v41 }
 0x6bd   :  { %2234 = vmatprep.subr.mxu1 %v2426_v41 }
 0x6bf   :  { %2227 = vmatmul.mubr.msk.f32.vlgmr.msra.gmra.mrb[18].mxu1 %vm160_vm2, %v1057_v40 }
 0x6c0   :  { %2236 = vmatprep.mubr.msk.f32.mxu1 %vm2427_vm1, %v2426_v41 }
 0x6de   :  { %v644_v42 = vpop.xlane.xlu1 %643 }
 0x6df   :  { %v648_v43 = vsub.f32 %v560_v20, %v644_v42 }
 0x6e1   :  { %v650_v44 = vmul.f32 1.442695, %v648_v43 }
 0x6e3   :  { %2398 = vpow2.f32 %v650_v44 }
 0x6ed   :  { %v2399_v46 = vpop.eup %2398 }
 0x6ee   :  { %v654_v48 = vsel %vm160_vm2, %v2399_v46, 0.0 }
 0x6ef   :  { %655 = vadd.xlane.f32.xlu0 %v654_v48 }
 0x705   :  { %664 = vrot.lane.b32.xlu0 %v2517_v47, %s2433_s6 }
 0x709   :  { %1232 = vrot.lane.b32.xlu0 %v2515_v45, %s2435_s8 }
 0x70d   :  { %1393 = vrot.lane.b32.xlu0 %v2517_v47, %s2436_s9 }
 0x711   :  { %1471 = vrot.lane.b32.xlu0 %v2515_v45, %s2436_s9 }
 0x715   :  { %1391 = vrot.lane.b32.xlu0 %v2517_v47, %s2437_s10 }
 0x77c   :  { %v656_v49 = vpop.xlane.xlu0 %655 }
 0x77d   :  { %2400 = vrcp.f32 %v656_v49 }
 0x780   :  { %v665_v50 = vpop.permute.xlu0 %664 }
 0x781   :  { %2200 = vmatpush3.msra.mxu0 %v665_v50 }
 0x782   :  { %2209 = vmatprep.subr.mxu0 %v23_v62 }
 0x784   :  { %v1233_v51 = vpop.permute.xlu0 %1232 }
 0x785   :  { %2235 = vmatpush3.msra.mxu1 %v1233_v51 }
 0x786   :  { %2244 = vmatprep.subr.mxu1 %v2426_v41 }
 0x787   :  { %v2401_v52 = vpop.eup %2400 }
 0x788   :  { %v661_v53 = vmul.f32 %v2401_v52, %v2399_v46  ;;  %v1394_v20 = vpop.permute.xlu0 %1393 }
 0x78a   :  { %2202 = vmatmul.mubr.msk.f32.vlgmr.msra.gmra.mrb[0].mxu0 %vm160_vm2, %v661_v53  ;;  %v812_v54 = vpop.f32.mrb[14].mxu1 }
 0x78b   :  { %v2208_v55 = vpop.f32.mrb[15].mxu1  ;;  %2210 = vmatpush3.msra.mxu0 %v23_v62 }
 0x78c   :  { %2214 = vmatprep.subr.mxu0 %v20_v63  ;;  %v1472_v22 = vpop.permute.xlu0 %1471 }
 0x78e   :  { %v1052_v56 = vpop.f32.mrb[16].mxu1 }
 0x78f   :  { %v2223_v57 = vpop.f32.mrb[17].mxu1  ;;  %v1134_v58 = vsel %vm160_vm2, %v1052_v56, -inf }
 0x790   :  { %1135 = vmax.xlane.f32.xlu1 %v1134_v58  ;;  %v1392_v24 = vpop.permute.xlu0 %1391  ;;  %v29_v57 = vld [vmem:[%s2756_s1 + $0x50] sm:$0xff] }
 0x792   :  { %v1130_v59 = vpop.f32.mrb[18].mxu1 }
 0x793   :  { %v2228_v60 = vpop.f32.mrb[19].mxu1  ;;  %v1137_v61 = vsel %vm160_vm2, %v1130_v59, -inf }
 0x794   :  { %1138 = vmax.xlane.f32.xlu1 %v1137_v61  ;;  %v1806_v61 = vsub.s32 6, %v2494_v26 }
 0x796   :  { %v1807_v62 = vrot.slane %v2500_v29, %v1806_v61  ;;  %v1957_v61 = vld [vmem:[%s2758_s2 + $0x60] sm:$0xff] }
 0x81d   :  { %v1136_v2 = vpop.xlane.xlu1 %1135 }
 0x81e   :  { %v1140_v3 = vsub.f32 %v1052_v56, %v1136_v2 }
 0x820   :  { %v1142_v4 = vmul.f32 1.442695, %v1140_v3 }
 0x821   :  { %v1139_v5 = vpop.xlane.xlu1 %1138 }
 0x822   :  { %2402 = vpow2.f32 %v1142_v4  ;;  %v1141_v6 = vsub.f32 %v1130_v59, %v1139_v5 }
 0x824   :  { %v1144_v7 = vmul.f32 1.442695, %v1141_v6 }
 0x826   :  { %2404 = vpow2.f32 %v1144_v7 }
 0x82c   :  { %v2403_v8 = vpop.eup %2402 }
 0x82d   :  { %v1146_v9 = vsel %vm160_vm2, %v2403_v8, 0.0 }
 0x82e   :  { %1147 = vadd.xlane.f32.xlu1 %v1146_v9 }
 0x830   :  { %v2405_v10 = vpop.eup %2404 }
 0x831   :  { %v1149_v11 = vsel %vm160_vm2, %v2405_v10, 0.0 }
 0x832   :  { %1150 = vadd.xlane.f32.xlu1 %v1149_v11 }
 0x843   :  { %1156 = vrot.lane.b32.xlu1 %v2517_v47, %s2435_s8 }
 0x847   :  { %1469 = vrot.lane.b32.xlu1 %v2515_v45, %s2437_s10 }
 0x85d   :  { %v736_v12 = vpop.f32.mrb[0].mxu0 }
 0x85e   :  { %v2203_v13 = vpop.f32.mrb[1].mxu0  ;;  %2211 = vmatprep.mubr.msk.f32.mxu0 %vm160_vm2, %v736_v12 }
 0x85f   :  { %2212 = vmatmul.mubr.msk.f32.vlgmr.msra.gmra.mrb[2].mxu0 %vm160_vm2, %v812_v54 }
 0x860   :  { %2216 = vmatprep.mubr.msk.f32.mxu0 %vm160_vm2, %v2563_v16  ;;  %2215 = vmatpush3.msra.mxu0 %v20_v63 }
 0x861   :  { %2229 = vmatprep.subr.mxu0 %v2426_v41 }
 0x867   :  { %2217 = vmatmul.mubr.msk.f32.vlgmr.msra.gmra.mrb[2].mxu0 %vm160_vm2, %v2565_v18 }
 0x868   :  { %2231 = vmatprep.mubr.msk.f32.mxu0 %vm2427_vm1, %v2426_v41 }
 0x8bb   :  { %v1148_v14 = vpop.xlane.xlu1 %1147 }
 0x8bc   :  { %2406 = vrcp.f32 %v1148_v14 }
 0x8bf   :  { %v1151_v15 = vpop.xlane.xlu1 %1150 }
 0x8c0   :  { %2408 = vrcp.f32 %v1151_v15 }
 0x8c3   :  { %v1157_v19 = vpop.permute.xlu1 %1156 }
 0x8c4   :  { %2230 = vmatpush3.msra.mxu0 %v1157_v19  ;;  %v21_v19 = vld [vmem:[%s2756_s1 + $0x10] sm:$0xff] }
 0x8c5   :  { %2239 = vmatprep.subr.mxu0 %v26_v17 }
 0x8c6   :  { %v2407_v16 = vpop.eup %2406 }
 0x8c7   :  { %v1153_v21 = vmul.f32 %v2407_v16, %v2403_v8  ;;  %v1470_v31 = vpop.permute.xlu1 %1469 }
 0x8c9   :  { %2232 = vmatmul.mubr.msk.f32.vlgmr.msra.gmra.mrb[4].mxu0 %vm160_vm2, %v1153_v21  ;;  %v27_v21 = vld [vmem:[%s2756_s1 + $0x40] sm:$0xff] }
 0x8ca   :  { %v2409_v18 = vpop.eup %2408  ;;  %2240 = vmatpush3.msra.mxu0 %v26_v17 }
 0x8cb   :  { %v1155_v23 = vmul.f32 %v2409_v18, %v2405_v10  ;;  %2249 = vmatprep.subr.mxu0 %v2426_v41  ;;  %v30_v18 = vld [vmem:[%s2756_s1 + $0x58] sm:$0xff] }
 0x8cd   :  { %2237 = vmatmul.mubr.msk.f32.vlgmr.msra.gmra.mrb[20].mxu1 %vm160_vm2, %v1155_v23  ;;  %v1945_v23 = vld [vmem:[%s2758_s2] sm:$0xff] }
 0x8ce   :  { %2245 = vmatpush3.xpose.msk.msra.mxu1 %vm160_vm2, %v1394_v20  ;;  %2246 = vmatprep.mubr.msk.f32.mxu1 %vm2427_vm1, %v2426_v41  ;;  %v24_v20 = vld [vmem:[%s2756_s1 + $0x28] sm:$0xff] }
 0x8cf   :  { %2254 = vmatprep.subr.mxu1 %v2426_v41  ;;  %v2323_v16 = vpack.c.bf16 %v24_v20, %v21_v19 }
 0x8d1   :  { %2247 = vmatmul.mubr.msk.f32.vlgmr.msra.gmra.mrb[22].mxu1 %vm160_vm2, %v1392_v24  ;;  %v1946_v24 = vld [vmem:[%s2758_s2 + $0x8] sm:$0xff] }
 0x8d2   :  { %2256 = vmatprep.mubr.msk.f32.mxu1 %vm2427_vm1, %v2426_v41 }
 0x99c   :  { %v1228_v25 = vpop.f32.mrb[4].mxu0 }
 0x99d   :  { %v2233_v27 = vpop.f32.mrb[5].mxu0  ;;  %2241 = vmatprep.mubr.msk.f32.mxu0 %vm160_vm2, %v1228_v25  ;;  %v1947_v25 = vld [vmem:[%s2758_s2 + $0x10] sm:$0xff] }
 0x99e   :  { %v2331_v27 = vpack.c.bf16 %v1946_v24, %v1945_v23 }
 0x9a0   :  { %v1304_v28 = vpop.f32.mrb[20].mxu1 }
 0x9a1   :  { %v2238_v30 = vpop.f32.mrb[21].mxu1  ;;  %2242 = vmatmul.mubr.msk.f32.vlgmr.msra.gmra.mrb[2].mxu0 %vm160_vm2, %v1304_v28  ;;  %v1948_v28 = vld [vmem:[%s2758_s2 + $0x18] sm:$0xff] }
 0x9a2   :  { %2250 = vmatpush3.xpose.msk.msra.mxu0 %vm160_vm2, %v1472_v22  ;;  %2251 = vmatprep.mubr.msk.f32.mxu0 %vm2427_vm1, %v2426_v41  ;;  %v2327_v22 = vpack.c.bf16 %v30_v18, %v27_v21  ;;  %v2335_v30 = vpack.c.bf16 %v1948_v28, %v1947_v25  ;;  %v1963_v18 = vsub.s32 7, %v2494_v26 }
 0x9a3   :  { %2259 = vmatprep.subr.mxu0 %v2426_v41 }
 0x9a4   :  { %v1465_v32 = vpop.f32.mrb[22].mxu1 }
 0x9a5   :  { %v2248_v33 = vpop.f32.mrb[23].mxu1  ;;  %2252 = vmatmul.mubr.msk.f32.vlgmr.msra.gmra.mrb[6].mxu0 %vm160_vm2, %v1470_v31  ;;  %v1547_v34 = vsel %vm160_vm2, %v1465_v32, -inf  ;;  %v1949_v31 = vld [vmem:[%s2758_s2 + $0x20] sm:$0xff] }
 0x9a6   :  { %1548 = vmax.xlane.f32.xlu0 %v1547_v34  ;;  %2261 = vmatprep.mubr.msk.f32.mxu0 %vm2427_vm1, %v2426_v41 }
 0xa33   :  { %v1549_v35 = vpop.xlane.xlu0 %1548 }
 0xa34   :  { %v1553_v36 = vsub.f32 %v1465_v32, %v1549_v35  ;;  %v1950_v32 = vld [vmem:[%s2758_s2 + $0x28] sm:$0xff] }
 0xa35   :  { %v2339_v33 = vpack.c.bf16 %v1950_v32, %v1949_v31 }
 0xa36   :  { %v1555_v37 = vmul.f32 1.442695, %v1553_v36 }
 0xa38   :  { %2410 = vpow2.f32 %v1555_v37 }
 0xa42   :  { %v2411_v38 = vpop.eup %2410 }
 0xa43   :  { %v1559_v39 = vsel %vm160_vm2, %v2411_v38, 0.0 }
 0xa44   :  { %1560 = vadd.xlane.f32.xlu0 %v1559_v39 }
 0xa78   :  { %v1543_v40 = vpop.f32.mrb[6].mxu0 }
 0xa79   :  { %v2253_v42 = vpop.f32.mrb[7].mxu0  ;;  %v1550_v43 = vsel %vm160_vm2, %v1543_v40, -inf }
 0xa7a   :  { %1551 = vmax.xlane.f32.xlu1 %v1550_v43  ;;  %v1846_v42 = vsub.s32 5, %v2494_v26 }
 0xa8b   :  { %1645 = vrot.lane.b32.xlu1 %v2515_v45, %s2438_s17 }
 0xad1   :  { %v1561_v51 = vpop.xlane.xlu0 %1560 }
 0xb07   :  { %v1552_v44 = vpop.xlane.xlu1 %1551 }
 0xb08   :  { %v1554_v46 = vsub.f32 %v1543_v40, %v1552_v44  ;;  %v1840_v40 = vsub.s32 4, %v2494_v26 }
 0xb0a   :  { %v1557_v48 = vmul.f32 1.442695, %v1554_v46  ;;  %v1841_v43 = vrot.slane %v2500_v29, %v1840_v40 }
 0xb0b   :  { %v1646_v41 = vpop.permute.xlu1 %1645 }
 0xb0c   :  { %2412 = vpow2.f32 %v1557_v48  ;;  %2260 = vmatpush3.msra.mxu0 %v1646_v41 }
 0xb0d   :  { %2414 = vrcp.f32 %v1561_v51  ;;  %2264 = vmatprep.subr.mxu0 %v29_v57 }
 0xb16   :  { %v2413_v49 = vpop.eup %2412 }
 0xb17   :  { %v1562_v50 = vsel %vm160_vm2, %v2413_v49, 0.0  ;;  %v2415_v53 = vpop.eup %2414 }
 0xb18   :  { %1563 = vadd.xlane.f32.xlu0 %v1562_v50  ;;  %v1566_v54 = vmul.f32 %v2415_v53, %v2411_v38 }
 0xb2e   :  { %1569 = vrot.lane.b32.xlu0 %v2517_v47, %s2438_s17 }
 0xba5   :  { %v1564_v52 = vpop.xlane.xlu0 %1563 }
 0xba6   :  { %2416 = vrcp.f32 %v1564_v52 }
 0xba9   :  { %v1570_v55 = vpop.permute.xlu0 %1569 }
 0xbaa   :  { %2255 = vmatpush3.msra.mxu1 %v1570_v55  ;;  %v1952_v55 = vld [vmem:[%s2758_s2 + $0x38] sm:$0xff] }
 0xbab   :  { %2257 = vmatmul.mubr.msk.f32.vlgmr.msra.gmra.mrb[24].mxu1 %vm160_vm2, %v1566_v54  ;;  %2324 = vmatprep.subr.bf16.mxu1 %v2323_v16  ;;  %v1951_v54 = vld [vmem:[%s2758_s2 + $0x30] sm:$0xff] }
 0xbac   :  { %2326 = vmatpush3.bf16.msra.mxu1 %v2323_v16 }
 0xbad   :  { %2328 = vmatprep.subr.bf16.mxu1 %v2327_v22 }
 0xbb0   :  { %v2417_v45 = vpop.eup %2416  ;;  %2330 = vmatpush3.bf16.msra.mxu1 %v2327_v22  ;;  %v1964_v22 = vrot.slane %v2500_v29, %v1963_v18 }
 0xbb1   :  { %v1568_v56 = vmul.f32 %v2417_v45, %v2413_v49  ;;  %v1847_v49 = vrot.slane %v2500_v29, %v1846_v42  ;;  %v2343_v45 = vpack.c.bf16 %v1952_v55, %v1951_v54 }
 0xbb3   :  { %2262 = vmatmul.mubr.msk.f32.vlgmr.msra.gmra.mrb[8].mxu0 %vm160_vm2, %v1568_v56  ;;  %v1953_v56 = vld [vmem:[%s2758_s2 + $0x40] sm:$0xff] }
 0xbb4   :  { %2265 = vmatpush3.msra.mxu0 %v29_v57  ;;  %v1954_v57 = vld [vmem:[%s2758_s2 + $0x48] sm:$0xff] }
 0xbb5   :  { %2332 = vmatprep.subr.bf16.mxu0 %v2331_v27 }
 0xc7e   :  { %v1641_v47 = vpop.f32.mrb[24].mxu1 }
 0xc7f   :  { %v2258_v58 = vpop.f32.mrb[25].mxu1  ;;  %2266 = vmatprep.mubr.msk.f32.mxu0 %vm160_vm2, %v1641_v47  ;;  %v2347_v47 = vpack.c.bf16 %v1954_v57, %v1953_v56 }
 0xc80   :  { %v1955_v58 = vld [vmem:[%s2758_s2 + $0x50] sm:$0xff] }
 0xc86   :  { %v1717_v59 = vpop.f32.mrb[8].mxu0 }
 0xc87   :  { %v2263_v60 = vpop.f32.mrb[9].mxu0  ;;  %2267 = vmatmul.mubr.msk.f32.vlgmr.msra.gmra.mrb[2].mxu0 %vm160_vm2, %v1717_v59  ;;  %v1956_v59 = vld [vmem:[%s2758_s2 + $0x58] sm:$0xff] }
 0xc88   :  { %2334 = vmatpush3.bf16.msra.mxu0 %v2331_v27  ;;  %v2351_v60 = vpack.c.bf16 %v1956_v59, %v1955_v58 }
 0xc89   :  { %2336 = vmatprep.subr.bf16.mxu0 %v2335_v30 }
 0xc8c   :  { %2338 = vmatpush3.bf16.msra.mxu0 %v2335_v30 }
 0xc8d   :  { %2340 = vmatprep.subr.bf16.mxu0 %v2339_v33 }
 0xc90   :  { %2342 = vmatpush3.bf16.msra.mxu0 %v2339_v33 }
 0xc91   :  { %2344 = vmatprep.subr.bf16.mxu0 %v2343_v45 }
 0xc94   :  { %2346 = vmatpush3.bf16.msra.mxu0 %v2343_v45 }
 0xc95   :  { %2348 = vmatprep.subr.bf16.mxu0 %v2347_v47 }
 0xc98   :  { %2350 = vmatpush3.bf16.msra.mxu0 %v2347_v47 }
 0xc99   :  { %2352 = vmatprep.subr.bf16.mxu0 %v2351_v60 }
 0xc9c   :  { %2354 = vmatpush3.bf16.msra.mxu0 %v2351_v60 }
 0xd5a   :  { %v2268_v63 = vpop.f32.mrb[2].mxu0 }
 0xd5b   :  { %v1809_v2 = vadd.f32 %v2268_v63, %v1807_v62  ;;  %v1793_v3 = vpop.f32.mrb[3].mxu0 }
 0xd5c   :  { %v1808_v4 = vadd.f32 %v1807_v62, %v1793_v3  ;;  %v1958_v62 = vld [vmem:[%s2758_s2 + $0x68] sm:$0xff]  ;;  %v1960_v3 = vld [vmem:[%s2758_s2 + $0x78] sm:$0xff] }
 0xd5d   :  { %v2662_v5 = vadd.f32 %v1809_v2, %v2472_v1  ;;  %v2355_v63 = vpack.c.bf16 %v1958_v62, %v1957_v61  ;;  %v1959_v2 = vld [vmem:[%s2758_s2 + $0x70] sm:$0xff] }
 0xd5e   :  { %v2665_v6 = vadd.f32 %v1808_v4, %v2467_v0  ;;  %v2359_v4 = vpack.c.bf16 %v1960_v3, %v1959_v2 }
 0xd5f   :  { %v1815_v7 = vsel %vm32_vm0, %v2662_v5, 0.0  ;;  %2356 = vmatprep.subr.bf16.mxu0 %v2355_v63 }
 0xd60   :  { %1816 = vadd.xlane.f32.xlu0 %v1815_v7  ;;  %v1812_v8 = vsel %vm32_vm0, %v2665_v6, 0.0  ;;  %2358 = vmatpush3.bf16.msra.mxu0 %v2355_v63  ;;  %v1852_v7 = vsub.s32 1, %v2494_v26 }
 0xd61   :  { %1813 = vadd.xlane.f32.xlu1 %v1812_v8  ;;  %2360 = vmatprep.subr.bf16.mxu0 %v2359_v4 }
 0xd62   :  { %v1853_v8 = vrot.slane %v2500_v29, %v1852_v7 }
 0xd64   :  { %2362 = vmatpush3.bf16.msra.mxu0 %v2359_v4 }
 0xded   :  { %v1817_v9 = vpop.xlane.xlu0 %1816 }
 0xdee   :  { %v1819_v10 = vmul.f32 0.03125, %v1817_v9  ;;  %v1814_v11 = vpop.xlane.xlu1 %1813 }
 0xdef   :  { %v1818_v12 = vmul.f32 0.03125, %v1814_v11 }
 0xdf0   :  { %v1821_v13 = vsub.f32 %v2662_v5, %v1819_v10 }
 0xdf1   :  { %v1820_v1 = vsub.f32 %v2665_v6, %v1818_v12 }
 0xdf2   :  { %v1823_v14 = vmul.f32 %v1821_v13, %v1821_v13 }
 0xdf3   :  { %v1822_v15 = vmul.f32 %v1820_v1, %v1820_v1 }
 0xdf4   :  { %v1827_v0 = vsel %vm32_vm0, %v1823_v14, 0.0 }
 0xdf5   :  { %1828 = vadd.xlane.f32.xlu1 %v1827_v0  ;;  %v1824_v17 = vsel %vm32_vm0, %v1822_v15, 0.0 }
 0xdf6   :  { %1825 = vadd.xlane.f32.xlu0 %v1824_v17 }
 0xe82   :  { %v1829_v34 = vpop.xlane.xlu1 %1828 }
 0xe83   :  { %v1831_v35 = vmul.f32 0.03125, %v1829_v34  ;;  %v1826_v36 = vpop.xlane.xlu0 %1825 }
 0xe84   :  { %v1830_v37 = vmul.f32 0.03125, %v1826_v36 }
 0xe85   :  { %v1833_v38 = vadd.f32 1e-05, %v1831_v35 }
 0xe86   :  { %v1832_v39 = vadd.f32 1e-05, %v1830_v37 }
 0xe87   :  { %2418 = vrsqrt.f32 %v1833_v38 }
 0xe88   :  { %2420 = vrsqrt.f32 %v1832_v39 }
 0xe91   :  { %v2419_v44 = vpop.eup %2418 }
 0xe92   :  { %v2421_v46 = vpop.eup %2420  ;;  %v1837_v48 = vmul.f32 %v2419_v44, %v1821_v13 }
 0xe93   :  { %v1836_v41 = vmul.f32 %v2421_v46, %v1820_v1 }
 0xe94   :  { %v1843_v50 = vmul.f32 %v1841_v43, %v1837_v48 }
 0xe95   :  { %v1842_v51 = vmul.f32 %v1841_v43, %v1836_v41 }
 0xe96   :  { %v1849_v53 = vadd.f32 %v1847_v49, %v1843_v50 }
 0xe97   :  { %v1848_v52 = vadd.f32 %v1847_v49, %v1842_v51 }
 0xe99   :  { %2277 = vmatprep.mubr.msk.f32.mxu1 %vm32_vm0, %v1848_v52 }
 0xe9a   :  { %2278 = vmatmul.mubr.msk.f32.vlgmr.msra.gmra.mrb[26].mxu1 %vm32_vm0, %v1849_v53 }
 0xf6d   :  { %v2279_v9 = vpop.f32.mrb[26].mxu1 }
 0xf6e   :  { %v1932_v10 = vadd.f32 %v2279_v9, %v1853_v8  ;;  %v1926_v11 = vpop.f32.mrb[27].mxu1 }
 0xf6f   :  { %v1927_v12 = vadd.f32 %v1926_v11, %v1853_v8 }
 0xf70   :  { %v1938_v13 = vmul.f32 0.70710677, %v1932_v10  ;;  %v1936_v20 = vmul.f32 0.5, %v1932_v10 }
 0xf71   :  { %v1937_v1 = vmul.f32 0.70710677, %v1927_v12  ;;  %v1935_v17 = vmul.f32 0.5, %v1927_v12 }
 0xf72   :  { %2422 = verf.f32 %v1938_v13 }
 0xf73   :  { %2424 = verf.f32 %v1937_v1 }
 0xf7c   :  { %v2423_v14 = vpop.eup %2422 }
 0xf7d   :  { %v2425_v15 = vpop.eup %2424  ;;  %v1942_v0 = vadd.f32 1.0, %v2423_v14 }
 0xf7e   :  { %v1941_v19 = vadd.f32 1.0, %v2425_v15 }
 0xf7f   :  { %v1944_v21 = vmul.f32 %v1942_v0, %v1936_v20 }
 0xf80   :  { %v1943_v16 = vmul.f32 %v1941_v19, %v1935_v17 }
 0xf82   :  { %2312 = vmatprep.mubr.f32.mxu0 %v1943_v16 }
 0xf83   :  { %2313 = vmatmul.mubr.f32.vlgmr.msra.gmra.mrb[10].mxu0 %v1944_v21 }
0x1056   :  { %v2314_v23 = vpop.f32.mrb[10].mxu0 }
0x1057   :  { %v2037_v24 = vadd.f32 %v2314_v23, %v1964_v22  ;;  %v2031_v25 = vpop.f32.mrb[11].mxu0 }
0x1058   :  { %v2032_v27 = vadd.f32 %v2031_v25, %v1964_v22 }
0x1059   :  { %v2041_v28 = vadd.f32 %v2037_v24, %v2662_v5 }
0x105a   :  { %v2040_v30 = vadd.f32 %v2032_v27, %v2665_v6 }
0x105b   :  { %2043 = vst.msk [vmem:[%s2759_s4 + $0x8] sm:$0xff] %vm32_vm0, %v2041_v28 }
0x105c   :  { %2042 = vst.msk [vmem:[%s2759_s4] sm:$0xff] %vm32_vm0, %v2040_v30 }

</bundles_post_ra>
